<compile_context>
chip_gen: v5e
topology: v5e:2x2
jax: 0.10.0
libtpu: 0.0.40
codegen_flags: <defaults>
</compile_context>

<pallas_src>
import functools
import math

import jax
import jax.numpy as jnp
from jax import lax
from jax.experimental import pallas as pl
from jax.experimental.pallas import tpu as pltpu


def _topk_gating_kernel(x_ref, w_ref, onehot_ref, gates_ref, idx_ref, *, k: int):
    # Lane-dense logits: (E, tm), tokens on the lane axis.
    logits_t = lax.dot_general(
        w_ref[...], x_ref[...],
        dimension_numbers=(((1,), (1,)), ((), ())),
        preferred_element_type=jnp.float32,
    )
    E, tm = logits_t.shape

    expert_ids = lax.broadcasted_iota(jnp.int32, (E, tm), 0)

    work = logits_t
    one_hot = jnp.zeros((E, tm), dtype=onehot_ref.dtype)

    # Iterative top-k (k is small & static): pick max, record, mask, repeat.
    # Values come out sorted descending -> matches torch.topk ordering, so the
    # softmax over them matches F.softmax(topk_val, dim=-1).  Ties resolve to
    # the smallest expert index (first occurrence), same as torch.topk.
    top_val = None
    denom = None
    exps = []
    for j in range(k):
        mx = jnp.max(work, axis=0, keepdims=True)                        # (1, tm)
        is_max = work == mx
        am = jnp.min(jnp.where(is_max, expert_ids, E),
                     axis=0, keepdims=True)                              # (1, tm)
        sel = expert_ids == am
        one_hot = jnp.where(sel, jnp.ones_like(one_hot), one_hot)

        # Direct row writes: lane-dense, no concatenates of skinny columns.
        idx_ref[pl.ds(j, 1), :] = am.astype(idx_ref.dtype)

        if j == 0:
            top_val = mx  # row-wise max of the selected logits (values descend)
        e = jnp.exp(mx - top_val)
        denom = e if denom is None else denom + e
        exps.append(e)

        work = jnp.where(sel, jnp.full_like(work, -jnp.inf), work)

    # Softmax over the k selected logits (exact divide for bit-parity with
    # the torch reference; switch approx=True to route the divide to the idle
    # EUP slot if last-ulp parity is not required).
    inv = pl.reciprocal(denom, approx=False)
    for j in range(k):
        gates_ref[pl.ds(j, 1), :] = (exps[j] * inv).astype(gates_ref.dtype)

    onehot_ref[...] = one_hot


def _vmem_limit_bytes(tm, D, E, k, in_itemsize):
    x_bytes = 2 * tm * D * in_itemsize             # double-buffered x tile
    w_bytes = 2 * E * D * in_itemsize              # (small, resident) weight
    out_bytes = 2 * (E * tm * 4 + 2 * k * tm * 4)  # double-buffered outputs
    est = x_bytes + w_bytes + out_bytes
    # Generous headroom, but capped so v7x's 64 MiB physical VMEM is safe.
    return int(min(max(2 * est, 32 * 1024 * 1024), 48 * 1024 * 1024))


def topk_gating(x, w_gating, k: int = 2, *, tm: int = 512,
                compute_dtype=jnp.bfloat16):
    """x: (b, s, D); w_gating: (E, D) (same layout as nn.Linear.weight).

    Returns (one_hot (b,s,E) f32, gates (b,s,k) f32, topk_idx (b,s,k) i32).
    # TODO(synk): noisy_gating (training-time Gaussian noise) not implemented.
    # TODO(synk): topk indices are int32 (torch returns int64).
    """
    b, s, D = x.shape
    E = w_gating.shape[0]
    T = b * s

    # Tile choice:
    #   * T <= tm (or tm not a multiple of 128): one full-extent tile, always a
    #     legal block shape.
    #   * otherwise: pad T up to a multiple of tm and run a 1-D token grid.
    if tm % 128 != 0 or T <= tm:
        tm_eff = T
        t_pad = T
    else:
        tm_eff = tm
        t_pad = ((T + tm - 1) // tm) * tm

    x2 = x.reshape(T, D)
    if t_pad > T:
        x2 = jnp.pad(x2, ((0, t_pad - T), (0, 0)))
    x2 = x2.astype(compute_dtype)
    w = w_gating.astype(compute_dtype)

    grid = (t_pad // tm_eff,)
    kernel = functools.partial(_topk_gating_kernel, k=k)
    itemsize = jnp.dtype(compute_dtype).itemsize

    one_hot_t, gates_t, idx_t = pl.pallas_call(
        kernel,
        out_shape=(
            jax.ShapeDtypeStruct((E, t_pad), jnp.float32),
            jax.ShapeDtypeStruct((k, t_pad), jnp.float32),
            jax.ShapeDtypeStruct((k, t_pad), jnp.int32),
        ),
        grid_spec=pltpu.PrefetchScalarGridSpec(
            num_scalar_prefetch=0,
            grid=grid,
            in_specs=[
                pl.BlockSpec((tm_eff, D), lambda i: (i, 0)),   # x tile (streamed)
                pl.BlockSpec((E, D), lambda i: (0, 0)),        # gating weight
            ],
            out_specs=[
                pl.BlockSpec((E, tm_eff), lambda i: (0, i)),   # one_hot (lane-dense)
                pl.BlockSpec((k, tm_eff), lambda i: (0, i)),   # gates   (lane-dense)
                pl.BlockSpec((k, tm_eff), lambda i: (0, i)),   # indices (lane-dense)
            ],
        ),
        compiler_params=pltpu.CompilerParams(
            dimension_semantics=("parallel",),
            vmem_limit_bytes=_vmem_limit_bytes(tm_eff, D, E, k, itemsize),
        ),
    )(x2, w)

    if t_pad > T:
        one_hot_t = one_hot_t[:, :T]
        gates_t = gates_t[:, :T]
        idx_t = idx_t[:, :T]

    one_hot = one_hot_t.T.reshape(b, s, E)
    gates = gates_t.T.reshape(b, s, k)
    topk_idx = idx_t.T.reshape(b, s, k)
    return one_hot, gates, topk_idx


def _jax_reference(x, w_gating, k):
    logits = jnp.einsum("bsd,ed->bse", x, w_gating,
                        preferred_element_type=jnp.float32)
    val, idx = lax.top_k(logits, k)
    gates = jax.nn.softmax(val, axis=-1)
    one_hot = jnp.sum(jax.nn.one_hot(idx, w_gating.shape[0],
                                     dtype=jnp.float32), axis=-2)
    return one_hot, gates, idx


if __name__ == "__main__":
    E, k = 8, 2

    # ---- Test 1: small shapes, exact f32 path, strict check vs pure JAX. ----
    b, s, D = 2, 8, 32
    key = jax.random.PRNGKey(0)
    kx, kw = jax.random.split(key)
    x = jax.random.normal(kx, (b, s, D), dtype=jnp.float32)
    bound = 1.0 / math.sqrt(D)  # mimic nn.Linear's uniform(-1/sqrt(D), 1/sqrt(D))
    w_gating = jax.random.uniform(kw, (E, D), dtype=jnp.float32,
                                  minval=-bound, maxval=bound)

    one_hot, gates, topk_idx = topk_gating(x, w_gating, k=k,
                                           compute_dtype=jnp.float32)
    jax.block_until_ready((one_hot, gates, topk_idx))

    onehot_ref, gates_ref, idx_ref = _jax_reference(x, w_gating, k)
    assert jnp.array_equal(topk_idx, idx_ref.astype(jnp.int32)), "idx mismatch"
    assert jnp.allclose(gates, gates_ref, atol=1e-5), "gates mismatch"
    assert jnp.array_equal(one_hot, onehot_ref), "one_hot mismatch"

    # ---- Test 2: tiled, lane-dense, bf16-matmul path (perf configuration). ----
    b2, s2, D2 = 4, 256, 64            # T = 1024 tokens, grid of 4 at tm = 256
    kx2, kw2 = jax.random.split(jax.random.PRNGKey(1))
    x2 = jax.random.normal(kx2, (b2, s2, D2), dtype=jnp.float32)
    bound2 = 1.0 / math.sqrt(D2)
    w2 = jax.random.uniform(kw2, (E, D2), dtype=jnp.float32,
                            minval=-bound2, maxval=bound2)

    oh2, g2, i2 = topk_gating(x2, w2, k=k, tm=256)     # bf16 matmul by default
    jax.block_until_ready((oh2, g2, i2))

    # Internal-consistency / structural checks (robust to bf16 rounding).
    assert jnp.allclose(jnp.sum(g2, axis=-1), 1.0, atol=1e-3), "gates not normalized"
    assert jnp.all(g2[..., :-1] >= g2[..., 1:] - 1e-6), "gates not sorted descending"
    assert jnp.array_equal(jnp.sum(oh2, axis=-1),
                           jnp.full((b2, s2), float(k))), "one_hot row sums != k"
    assert bool(jnp.all((i2 >= 0) & (i2 < E))), "indices out of range"
    picked = jnp.take_along_axis(oh2, i2, axis=-1)
    assert jnp.array_equal(picked, jnp.ones_like(picked)), "one_hot/idx inconsistent"

    # Routing should agree with an f32 reference for the vast majority of tokens.
    logits2_ref = jnp.einsum("bsd,ed->bse", x2, w2,
                             preferred_element_type=jnp.float32)
    _, idx2_ref = lax.top_k(logits2_ref, k)
    top1_match = jnp.mean((i2[..., 0] == idx2_ref[..., 0]).astype(jnp.float32))
    assert float(top1_match) > 0.9, "bf16 routing diverged from f32 reference"

    # ---- Test 3: non-divisible token count exercises the padding path. ----
    b3, s3, D3 = 4, 150, 32            # T = 600, tm = 256 -> padded to 768
    kx3, kw3 = jax.random.split(jax.random.PRNGKey(2))
    x3 = jax.random.normal(kx3, (b3, s3, D3), dtype=jnp.float32)
    bound3 = 1.0 / math.sqrt(D3)
    w3 = jax.random.uniform(kw3, (E, D3), dtype=jnp.float32,
                            minval=-bound3, maxval=bound3)

    oh3, g3, i3 = topk_gating(x3, w3, k=k, tm=256, compute_dtype=jnp.float32)
    jax.block_until_ready((oh3, g3, i3))

    onehot3_ref, gates3_ref, idx3_ref = _jax_reference(x3, w3, k)
    assert jnp.array_equal(i3, idx3_ref.astype(jnp.int32)), "padded-path idx mismatch"
    assert jnp.allclose(g3, gates3_ref, atol=1e-5), "padded-path gates mismatch"
    assert jnp.array_equal(oh3, onehot3_ref), "padded-path one_hot mismatch"

    print("KERNEL_OK")
</pallas_src>

<mosaic_0001>
module attributes {stable_mosaic.version = 11 : i64} {
  func.func @_topk_gating_kernel(%arg0: i32, %arg1: memref<16x32xf32, #tpu.memory_space<vmem>>, %arg2: memref<8x32xf32, #tpu.memory_space<vmem>>, %arg3: memref<8x16xf32, #tpu.memory_space<vmem>>, %arg4: memref<2x16xf32, #tpu.memory_space<vmem>>, %arg5: memref<2x16xi32, #tpu.memory_space<vmem>>) attributes {dimension_semantics = [#tpu.dimension_semantics<parallel>], iteration_bounds = array<i64: 1>, scalar_prefetch = 0 : i64, scratch_operands = 0 : i64, tpu.core_type = #tpu.core_type<tc>, window_params = [{transform_indices = @transform_0, window_bounds = array<i64: 16, 32>}, {pipeline_mode = #tpu.pipeline_mode<synchronous>, transform_indices = @transform_1, window_bounds = array<i64: 8, 32>}, {transform_indices = @transform_2, window_bounds = array<i64: 8, 16>}, {transform_indices = @transform_3, window_bounds = array<i64: 2, 16>}, {transform_indices = @transform_4, window_bounds = array<i64: 2, 16>}]} {
    %c0 = arith.constant 0 : index
    %c0_0 = arith.constant 0 : index
    %0 = vector.load %arg2[%c0, %c0_0] : memref<8x32xf32, #tpu.memory_space<vmem>>, vector<8x32xf32>
    %c0_1 = arith.constant 0 : index
    %c0_2 = arith.constant 0 : index
    %1 = vector.load %arg1[%c0_1, %c0_2] : memref<16x32xf32, #tpu.memory_space<vmem>>, vector<16x32xf32>
    %cst = arith.constant dense<0.000000e+00> : vector<8x16xf32>
    %2 = tpu.matmul %0, %1, %cst {dimension_numbers = #tpu.dot_dimension_numbers<[1], [1], [0], [0], [0, 0, 1, 0], [], []>} : vector<8x32xf32>, vector<16x32xf32>, vector<8x16xf32> -> vector<8x16xf32>
    %3 = tpu.iota {dimensions = array<i32: 0>} : vector<8x16xi32>
    %cst_3 = arith.constant 0.000000e+00 : f32
    %4 = vector.broadcast %cst_3 : f32 to vector<8x16xf32>
    %cst_4 = arith.constant dense<0xFF800000> : vector<16xf32>
    %5 = vector.multi_reduction <maximumf>, %2, %cst_4 [0] : vector<8x16xf32> to vector<16xf32>
    %6 = vector.shape_cast %5 : vector<16xf32> to vector<1x16xf32>
    %7 = vector.broadcast %6 : vector<1x16xf32> to vector<8x16xf32>
    %8 = arith.cmpf oeq, %2, %7 : vector<8x16xf32>
    %c8_i32 = arith.constant 8 : i32
    %9 = vector.broadcast %c8_i32 : i32 to vector<8x16xi32>
    %10 = arith.select %8, %3, %9 : vector<8x16xi1>, vector<8x16xi32>
    %cst_5 = arith.constant dense<2147483647> : vector<16xi32>
    %11 = vector.multi_reduction <minsi>, %10, %cst_5 [0] : vector<8x16xi32> to vector<16xi32>
    %12 = vector.shape_cast %11 : vector<16xi32> to vector<1x16xi32>
    %13 = vector.broadcast %12 : vector<1x16xi32> to vector<8x16xi32>
    %14 = arith.cmpi eq, %3, %13 : vector<8x16xi32>
    %cst_6 = arith.constant 1.000000e+00 : f32
    %15 = vector.broadcast %cst_6 : f32 to vector<8x16xf32>
    %16 = arith.select %14, %15, %4 : vector<8x16xi1>, vector<8x16xf32>
    %c0_7 = arith.constant 0 : index
    %c0_8 = arith.constant 0 : index
    %17 = vector.load %arg5[%c0_7, %c0_8] : memref<2x16xi32, #tpu.memory_space<vmem>>, vector<1x16xi32>
    tpu.vector_store %arg5[%c0_7, %c0_8], %12 {strides = array<i32>} : memref<2x16xi32, #tpu.memory_space<vmem>>, vector<1x16xi32>,
    %18 = arith.subf %6, %6 : vector<1x16xf32>
    %19 = math.exp %18 : vector<1x16xf32>
    %cst_9 = arith.constant 0xFF800000 : f32
    %20 = vector.broadcast %cst_9 : f32 to vector<8x16xf32>
    %21 = arith.select %14, %20, %2 : vector<8x16xi1>, vector<8x16xf32>
    %cst_10 = arith.constant dense<0xFF800000> : vector<16xf32>
    %22 = vector.multi_reduction <maximumf>, %21, %cst_10 [0] : vector<8x16xf32> to vector<16xf32>
    %23 = vector.shape_cast %22 : vector<16xf32> to vector<1x16xf32>
    %24 = vector.broadcast %23 : vector<1x16xf32> to vector<8x16xf32>
    %25 = arith.cmpf oeq, %21, %24 : vector<8x16xf32>
    %c8_i32_11 = arith.constant 8 : i32
    %26 = vector.broadcast %c8_i32_11 : i32 to vector<8x16xi32>
    %27 = arith.select %25, %3, %26 : vector<8x16xi1>, vector<8x16xi32>
    %cst_12 = arith.constant dense<2147483647> : vector<16xi32>
    %28 = vector.multi_reduction <minsi>, %27, %cst_12 [0] : vector<8x16xi32> to vector<16xi32>
    %29 = vector.shape_cast %28 : vector<16xi32> to vector<1x16xi32>
    %30 = vector.broadcast %29 : vector<1x16xi32> to vector<8x16xi32>
    %31 = arith.cmpi eq, %3, %30 : vector<8x16xi32>
    %cst_13 = arith.constant 1.000000e+00 : f32
    %32 = vector.broadcast %cst_13 : f32 to vector<8x16xf32>
    %33 = arith.select %31, %32, %16 : vector<8x16xi1>, vector<8x16xf32>
    %c1 = arith.constant 1 : index
    %c0_14 = arith.constant 0 : index
    %34 = vector.load %arg5[%c1, %c0_14] : memref<2x16xi32, #tpu.memory_space<vmem>>, vector<1x16xi32>
    tpu.vector_store %arg5[%c1, %c0_14], %29 {strides = array<i32>} : memref<2x16xi32, #tpu.memory_space<vmem>>, vector<1x16xi32>,
    %35 = arith.subf %23, %6 : vector<1x16xf32>
    %36 = math.exp %35 : vector<1x16xf32>
    %37 = arith.addf %19, %36 : vector<1x16xf32>
    %38 = tpu.reciprocal %37 : vector<1x16xf32> -> vector<1x16xf32>
    %39 = arith.mulf %19, %38 : vector<1x16xf32>
    %c0_15 = arith.constant 0 : index
    %c0_16 = arith.constant 0 : index
    %40 = vector.load %arg4[%c0_15, %c0_16] : memref<2x16xf32, #tpu.memory_space<vmem>>, vector<1x16xf32>
    tpu.vector_store %arg4[%c0_15, %c0_16], %39 {strides = array<i32>} : memref<2x16xf32, #tpu.memory_space<vmem>>, vector<1x16xf32>,
    %41 = arith.mulf %36, %38 : vector<1x16xf32>
    %c1_17 = arith.constant 1 : index
    %c0_18 = arith.constant 0 : index
    %42 = vector.load %arg4[%c1_17, %c0_18] : memref<2x16xf32, #tpu.memory_space<vmem>>, vector<1x16xf32>
    tpu.vector_store %arg4[%c1_17, %c0_18], %41 {strides = array<i32>} : memref<2x16xf32, #tpu.memory_space<vmem>>, vector<1x16xf32>,
    %c0_19 = arith.constant 0 : index
    %c0_20 = arith.constant 0 : index
    %43 = vector.load %arg3[%c0_19, %c0_20] : memref<8x16xf32, #tpu.memory_space<vmem>>, vector<8x16xf32>
    tpu.vector_store %arg3[%c0_19, %c0_20], %33 {strides = array<i32>} : memref<8x16xf32, #tpu.memory_space<vmem>>, vector<8x16xf32>,
    return
  }
  func.func @transform_0(%arg0: i32) -> (i32, i32) {
    %c0_i32 = arith.constant 0 : i32
    %c0_i32_0 = arith.constant 0 : i32
    return %arg0, %c0_i32 : i32, i32
  }
  func.func @transform_1(%arg0: i32) -> (i32, i32) {
    %c0_i32 = arith.constant 0 : i32
    %c0_i32_0 = arith.constant 0 : i32
    %c0_i32_1 = arith.constant 0 : i32
    return %c0_i32, %c0_i32_0 : i32, i32
  }
  func.func @transform_2(%arg0: i32) -> (i32, i32) {
    %c0_i32 = arith.constant 0 : i32
    %c0_i32_0 = arith.constant 0 : i32
    return %c0_i32, %arg0 : i32, i32
  }
  func.func @transform_3(%arg0: i32) -> (i32, i32) {
    %c0_i32 = arith.constant 0 : i32
    %c0_i32_0 = arith.constant 0 : i32
    return %c0_i32, %arg0 : i32, i32
  }
  func.func @transform_4(%arg0: i32) -> (i32, i32) {
    %c0_i32 = arith.constant 0 : i32
    %c0_i32_0 = arith.constant 0 : i32
    return %c0_i32, %arg0 : i32, i32
  }
}

</mosaic_0001>

<bundles_post_ra>
// kernel: tpu_custom_call.1
= control target key start
LH: loop header
LB: loop body
LE: loop exit
PB: predicated region body
PF: predicated region fallthrough
CT: control target
= control target key end

     0   :  { %10 = vsyncpa [#allocation3], 0  ;;  %s407_s0 = inlined_call_operand.hbm [shape: f32[16,32], index: 0, kind: input, shape index: {}]   ;;  %s408_s1 = inlined_call_operand.hbm [shape: f32[8,32], index: 1, kind: input, shape index: {}]   ;;  %s409_s2 = inlined_call_operand.hbm [shape: f32[8,16], index: 2, kind: output, shape index: {0}]   ;;  %s410_s3 = inlined_call_operand.hbm [shape: f32[2,16], index: 3, kind: output, shape index: {1}]   ;;  %s411_s4 = inlined_call_operand.hbm [shape: s32[2,16], index: 4, kind: output, shape index: {2}]  }
   0x1   :  { %11 = vsyncpa [#allocation6], 0 }
   0x2   :  { %12 = vsyncpa [#allocation4], 0 }
   0x3   :  { %13 = vsyncpa [#allocation9], 0  ;;  %s18_s17 = sshll.u32 %s407_s0, 4  ;;  %s348_s18 = smov [#allocation2]   ;;  %s19_s17 = int_to_ptr.hbm [resolvable:$true] %s18_s17 }
   0x4   :  { %s20_s19 = sshll.u32 %s348_s18, 4  ;;  %s32_s22 = sshll.u32 %s408_s1, 4  ;;  %s21_s19 = int_to_ptr.vmem [resolvable:$true] %s20_s19  ;;  %s33_s22 = int_to_ptr.hbm [resolvable:$true] %s32_s22 }
   0x5   :  { %s349_s23 = smov 128   ;;  %s350_s24 = smov 8  }
   0x6   :  { %26 = dma.hbm_to_vmem [thread:$0]  %s19_s17, 256, %s21_s19, [#allocation3], %s349_s23, %s349_s23, %s350_s24  }
   0x7   :  { %s351_s25 = smov [#allocation5]  }
   0x8   :  { %s34_s26 = sshll.u32 %s351_s25, 4  ;;  %s35_s26 = int_to_ptr.vmem [resolvable:$true] %s34_s26 }
   0x9   :  { %37 = dma.hbm_to_vmem [thread:$0]  %s33_s22, 128, %s35_s26, [#allocation6]  }
   0xa   :  { %340 = dma.done.wait [#allocation3], 256  }
   0xb   :  { %341 = vsyncadd [#allocation3], 4294967040 }
   0xc   :  { %342 = dma.done.wait [#allocation6], 128  }
   0xd   :  { %343 = vsyncadd [#allocation6], 4294967168  ;;  %vm49_vm0 = vcmask 261120   ;;  %v48_v0 = vld [vmem:[#allocation2 + $0x8] sm:$0xff]  ;;  %v47_v1 = vld [vmem:[#allocation2] sm:$0xff]  ;;  %vm81_vm1 = vcmask 130048   ;;  %v79_v8 = vlaneseq }
   0xe   :  { %203 = vmatpush.xpose.msk.msra.mxu0 %vm49_vm0, %v48_v0  ;;  %v46_v2 = vld [vmem:[#allocation5] sm:$0xff]  ;;  %vm103_vm5 = vcmask 122880   ;;  %s352_s0 = smov [#allocation7]   ;;  %s161_s29 = sshll.u32 %s409_s2, 4  ;;  %v353_v44 = vmov 0.0   ;;  %s162_s29 = int_to_ptr.hbm [resolvable:$true] %s161_s29 }
   0xf   :  { %v80_v11 = vshrl.u32 %v79_v8, 7  ;;  %s159_s1 = sshll.u32 %s352_s0, 4  ;;  %s354_s2 = smov [#allocation8]   ;;  %s160_s1 = int_to_ptr.vmem [resolvable:$true] %s159_s1 }
  0x10   :  { %s170_s30 = sshll.u32 %s354_s2, 4  ;;  %s172_s7 = sshll.u32 %s410_s3, 4  ;;  %s171_s30 = int_to_ptr.vmem [resolvable:$true] %s170_s30  ;;  %s173_s7 = int_to_ptr.hbm [resolvable:$true] %s172_s7 }
  0x11   :  { %s355_s8 = smov [#allocation10]   ;;  %s183_s12 = sshll.u32 %s411_s4, 4  ;;  %s184_s12 = int_to_ptr.hbm [resolvable:$true] %s183_s12 }
  0x12   :  { %204 = vmatpush.xpose.msk.msra.mxu0 %vm49_vm0, %v47_v1  ;;  %s181_s9 = sshll.u32 %s355_s8, 4  ;;  %s182_s9 = int_to_ptr.vmem [resolvable:$true] %s181_s9 }
  0x15   :  { %205 = vmatmul.msk.f32.vlgmr.msra.gmra.mxu0 %vm49_vm0, %v46_v2 }
  0x92   :  { %v76_v3 = vpop.f32.mrf.mxu0 }
  0x93   :  { %v82_v4 = vsel %vm81_vm1, %v76_v3, -inf }
  0x94   :  { %v83_v5 = vrot.slane %v82_v4, 4 }
  0x96   :  { %v84_v6 = vmax.f32 %v82_v4, %v83_v5 }
  0x98   :  { %v85_v7 = vrot.slane %v84_v6, 2 }
  0x9a   :  { %v86_v9 = vmax.f32 %v84_v6, %v85_v7 }
  0x9c   :  { %v87_v10 = vrot.slane %v86_v9, 1 }
  0x9e   :  { %v88_v12 = vmax.f32 %v86_v9, %v87_v10 }
  0xa0   :  { %vm89_vm2 = vcmp.eq.f32.partialorder %v76_v3, %v88_v12  ;;  %v105_v27 = vsub.f32 %v88_v12, %v88_v12 }
  0xa1   :  { %v90_v13 = vsel %vm89_vm2, %v80_v11, 8 }
  0xa2   :  { %v91_v14 = vsel %vm81_vm1, %v90_v13, 2147483647  ;;  %v106_v30 = vmul.f32 1.442695, %v105_v27 }
  0xa3   :  { %v92_v15 = vrot.slane %v91_v14, 4 }
  0xa4   :  { %214 = vpow2.f32 %v106_v30 }
  0xa5   :  { %vm93_vm3 = vcmp.lt.s32.totalorder %v91_v14, %v92_v15 }
  0xa6   :  { %v94_v16 = vsel %vm93_vm3, %v91_v14, %v92_v15 }
  0xa7   :  { %v95_v17 = vrot.slane %v94_v16, 2 }
  0xa9   :  { %vm96_vm4 = vcmp.lt.s32.totalorder %v94_v16, %v95_v17 }
  0xaa   :  { %v97_v18 = vsel %vm96_vm4, %v94_v16, %v95_v17  ;;  %v215_v38 = vpop.eup %214 }
  0xab   :  { %v98_v19 = vrot.slane %v97_v18, 1 }
  0xad   :  { %vm99_vm6 = vcmp.lt.s32.totalorder %v97_v18, %v98_v19 }
  0xae   :  { %v100_v20 = vsel %vm99_vm6, %v97_v18, %v98_v19 }
  0xaf   :  { %vm101_vm7 = vcmp.eq.s32.totalorder %v80_v11, %v100_v20  ;;  %104 = vst.msk [vmem:[#allocation10] sm:$0x1] %vm103_vm5, %v100_v20 }
  0xb0   :  { %v108_v21 = vsel %vm101_vm7, -inf, %v76_v3  ;;  %v102_v45 = vsel %vm101_vm7, 1.0, %v353_v44 }
  0xb1   :  { %v109_v22 = vsel %vm81_vm1, %v108_v21, -inf }
  0xb2   :  { %v110_v23 = vrot.slane %v109_v22, 4 }
  0xb4   :  { %v111_v24 = vmax.f32 %v109_v22, %v110_v23 }
  0xb6   :  { %v112_v25 = vrot.slane %v111_v24, 2 }
  0xb8   :  { %v113_v26 = vmax.f32 %v111_v24, %v112_v25 }
  0xba   :  { %v114_v28 = vrot.slane %v113_v26, 1 }
  0xbc   :  { %v115_v29 = vmax.f32 %v113_v26, %v114_v28 }
  0xbe   :  { %vm116_vm8 = vcmp.eq.f32.partialorder %v108_v21, %v115_v29  ;;  %v131_v31 = vsub.f32 %v115_v29, %v88_v12 }
  0xbf   :  { %v117_v32 = vsel %vm116_vm8, %v80_v11, 8 }
  0xc0   :  { %v118_v33 = vsel %vm81_vm1, %v117_v32, 2147483647  ;;  %v132_v34 = vmul.f32 1.442695, %v131_v31 }
  0xc1   :  { %v119_v35 = vrot.slane %v118_v33, 4 }
  0xc2   :  { %216 = vpow2.f32 %v132_v34 }
  0xc3   :  { %vm120_vm9 = vcmp.lt.s32.totalorder %v118_v33, %v119_v35 }
  0xc4   :  { %v121_v36 = vsel %vm120_vm9, %v118_v33, %v119_v35 }
  0xc5   :  { %v122_v37 = vrot.slane %v121_v36, 2 }
  0xc7   :  { %vm123_vm10 = vcmp.lt.s32.totalorder %v121_v36, %v122_v37 }
  0xc8   :  { %v217_v39 = vpop.eup %216  ;;  %v124_v40 = vsel %vm123_vm10, %v121_v36, %v122_v37 }
  0xc9   :  { %v125_v41 = vrot.slane %v124_v40, 1  ;;  %v134_v42 = vadd.f32 %v217_v39, %v215_v38 }
  0xcb   :  { %vm126_vm11 = vcmp.lt.s32.totalorder %v124_v40, %v125_v41  ;;  %218 = vrcp.f32 %v134_v42  ;;  %v146_v50 = vand.u32 2147483648, %v134_v42  ;;  %v144_v52 = vand.u32 2147483647, %v134_v42 }
  0xcc   :  { %v127_v43 = vsel %vm126_vm11, %v124_v40, %v125_v41  ;;  %vm140_vm14 = vweird.f32 %v134_v42 }
  0xcd   :  { %vm128_vm12 = vcmp.eq.s32.totalorder %v80_v11, %v127_v43  ;;  %130 = vst.msk [vmem:[#allocation10 + $0x1] sm:$0x1] %vm103_vm5, %v127_v43  ;;  %v147_v54 = vor.u32 1.1754944e-38, %v146_v50  ;;  %vm145_vm0 = vcmp.eq.f32.partialorder %v144_v52, 8.507059e+37 }
  0xce   :  { %v129_v46 = vsel %vm128_vm12, 1.0, %v102_v45 }
  0xcf   :  { %153 = vst.msk [vmem:[#allocation7] sm:$0xff] %vm81_vm1, %v129_v46 }
  0xd0   :  { %164 = dma.vmem_to_hbm [thread:$0]  %s160_s1, 128, %s162_s29, [#allocation4]  }
  0xd1   :  { %v219_v47 = vpop.eup %218 }
  0xd2   :  { %v136_v48 = vmul.f32 %v219_v47, %v134_v42  ;;  %vm141_vm13 = vweird.f32 %v219_v47 }
  0xd3   :  { %vm142_vm15 = vmor %vm140_vm14, %vm141_vm13 }
  0xd4   :  { %v137_v49 = vsub.f32 1.0, %v136_v48 }
  0xd6   :  { %v138_v51 = vmul.f32 %v219_v47, %v137_v49 }
  0xd8   :  { %v139_v53 = vadd.f32 %v219_v47, %v138_v51 }
  0xda   :  { %v143_v55 = vsel %vm142_vm15, %v219_v47, %v139_v53 }
  0xdb   :  { %v148_v56 = vsel %vm145_vm0, %v147_v54, %v143_v55 }
  0xdc   :  { %v149_v57 = vmul.f32 %v215_v38, %v148_v56  ;;  %v151_v58 = vmul.f32 %v217_v39, %v148_v56 }
  0xde   :  { %150 = vst.msk [vmem:[#allocation8] sm:$0x1] %vm103_vm5, %v149_v57 }
  0xdf   :  { %152 = vst.msk [vmem:[#allocation8 + $0x1] sm:$0x1] %vm103_vm5, %v151_v58 }
  0xe0   :  { %175 = dma.vmem_to_hbm [thread:$0]  %s171_s30, 32, %s173_s7, [#allocation9]  }
  0xe1   :  { %186 = dma.vmem_to_hbm [thread:$0]  %s182_s9, 32, %s184_s12, [#allocation9]  }
  0xe2   :  { %344 = dma.done.wait [#allocation4], 128  }
  0xe3   :  { %345 = vsyncadd [#allocation4], 4294967168 }
  0xe4   :  { %346 = dma.done.wait [#allocation9], 64  }
  0xe5   :  { %347 = vsyncadd [#allocation9], 4294967232 }
  0xe6   :  { %199 = vsyncpa [#allocation3], 1 }
  0xe7   :  { %200 = vsyncpa [#allocation6], 1 }
  0xe8   :  { %201 = vsyncpa [#allocation4], 1 }
  0xe9   :  { %202 = vsyncpa [#allocation9], 1 }

</bundles_post_ra>
